<compile_context>
chip_gen: v7x
topology: tpu7x:2x2x1
jax: 0.10.0
libtpu: 0.0.40
codegen_flags: <defaults>
</compile_context>

<pallas_src>
from functools import partial

import jax
import jax.numpy as jnp
from jax.experimental import pallas as pl
from jax.experimental.pallas import tpu as pltpu


def gpsa_kernel(x_ref, wqkv_ref, wo_ref, bo_ref, pos_ref, gate_ref, o_ref, hv_ref,
                *, num_heads, head_dim, scale, batch_block):
    """One grid step == `batch_block` batch elements: full (N, C) token block, all heads."""
    N = x_ref.shape[1]
    C = x_ref.shape[2]
    w_dtype = wo_ref.dtype

    for bb in range(batch_block):                                    # independent batch elements
        x = x_ref[bb]                                                # (N, C)
        # fused q/k/v projection: (N, C) @ (C, 3C) -> (N, 3C), f32 accumulation (qkv_bias=False)
        qkv = jnp.dot(x, wqkv_ref[...], preferred_element_type=jnp.float32)

        for h in range(num_heads):                                   # static unroll, H is small here
            lo = h * head_dim
            q_h = qkv[:, lo:lo + head_dim]                           # (N, hd)
            k_h = qkv[:, C + lo:C + lo + head_dim]                   # (N, hd)
            v_h = qkv[:, 2 * C + lo:2 * C + lo + head_dim]           # (N, hd)

            # patch attention: softmax(q k^T * scale); divide -> EUP approx reciprocal
            s = jax.lax.dot_general(q_h, k_h, (((1,), (1,)), ((), ())),
                                    preferred_element_type=jnp.float32) * scale
            s = s - jnp.max(s, axis=-1, keepdims=True)
            es = jnp.exp(s)
            patch = es * pl.reciprocal(jnp.sum(es, axis=-1, keepdims=True), approx=True)

            # positional attention is batch-invariant: softmax precomputed in the wrapper.
            pos = pos_ref[h]                                         # (N, N), f32

            # gated mix + renormalisation (renorm kept to match reference; attn_drop p=0)
            g = gate_ref[0, h]                                       # sigmoid(gating_param[h]), SMEM scalar
            attn = patch + g * (pos - patch)                         # == (1-g)*patch + g*pos
            attn = attn * pl.reciprocal(jnp.sum(attn, axis=-1, keepdims=True), approx=True)

            # park this head's (attn @ v) slice in the (N, C) scratch; the output projection
            # is done once after the head loop with full K = C contraction.
            hv_ref[:, lo:lo + head_dim] = jnp.dot(attn, v_h, preferred_element_type=jnp.float32)

        out = jnp.dot(hv_ref[...].astype(w_dtype), wo_ref[...],
                      preferred_element_type=jnp.float32) + bo_ref[...]   # proj + bias (proj_drop p=0)
        o_ref[bb] = out.astype(o_ref.dtype)


def get_rel_indices(num_patches):
    """ConViT relative-index features stacked as (3, N, N): [indx, indy, indd]."""
    img = int(round(num_patches ** 0.5))
    assert img * img == num_patches, "GPSA expects a square number of patches"
    ind = jnp.arange(img)[None, :] - jnp.arange(img)[:, None]        # (S, S)
    indx = jnp.tile(ind, (img, img)).astype(jnp.float32)             # (N, N) column offsets
    indy = jnp.repeat(jnp.repeat(ind, img, axis=0), img, axis=1).astype(jnp.float32)
    indd = indx ** 2 + indy ** 2
    return jnp.stack([indx, indy, indd], axis=0)                     # (3, N, N)


def gpsa_pallas(x, wqkv, w_proj, b_proj, pos_w, pos_b, gating_param, *, num_heads,
                scale=None, batch_block=None, matmul_dtype=None, vmem_limit_bytes=None):
    """x: (B, N, C); wqkv: (C, 3C) = [Wq | Wk | Wv] in x @ W layout; w_proj: (C, C);
    b_proj: (C,); pos_w: (H, 3); pos_b: (H,); gating_param: (H,)."""
    B, N, C = x.shape
    assert C % num_heads == 0
    head_dim = C // num_heads
    if scale is None:
        scale = head_dim ** -0.5
    assert wqkv.shape == (C, 3 * C)
    assert w_proj.shape == (C, C)

    # Batch-invariant positional attention, computed once here instead of B*H times in-kernel.
    hi = jax.lax.Precision.HIGHEST
    rel = get_rel_indices(N)                                          # (3, N, N)
    pos_scores = (jnp.einsum("hf,fnm->hnm", pos_w.astype(jnp.float32), rel, precision=hi)
                  + pos_b.astype(jnp.float32)[:, None, None])
    pos_attn = jax.nn.softmax(pos_scores, axis=-1)                    # (H, N, N) f32, grid-resident

    b_proj2 = b_proj.reshape(1, C).astype(jnp.float32)
    # TODO(synk): sigmoid of the (H,) gating parameter is applied at the wrapper boundary
    # (no clean scalar-transcendental path in-kernel); the gated mix stays in-kernel.
    gate_sig = jax.nn.sigmoid(gating_param.astype(jnp.float32)).reshape(1, num_heads)

    # Optional bf16 matmul operands (v6e/v7x MXU native); accumulation + elementwise stay f32.
    if matmul_dtype is not None:
        x_mm = x.astype(matmul_dtype)
        wqkv_mm = wqkv.astype(matmul_dtype)
        w_proj_mm = w_proj.astype(matmul_dtype)
    else:
        x_mm, wqkv_mm, w_proj_mm = x, wqkv, w_proj

    if batch_block is None:
        # >= 2 parallel grid steps (one per v7x TensorCore) while amortising per-step overhead.
        batch_block = B // 2 if (B >= 2 and B % 2 == 0) else 1
    assert B % batch_block == 0
    grid = (B // batch_block,)

    in_sz = jnp.dtype(x_mm.dtype).itemsize
    w_sz = jnp.dtype(wqkv_mm.dtype).itemsize
    out_sz = jnp.dtype(x.dtype).itemsize

    if vmem_limit_bytes is None:
        est = (2 * batch_block * N * C * (in_sz + out_sz)             # x/out blocks (double-buffered)
               + 2 * (3 * C * C + C * C) * w_sz + 2 * C * 4           # weights + bias (double-buffered)
               + 2 * num_heads * N * N * 4                            # pos table (double-buffered)
               + N * C * 4                                            # hv scratch
               + 8 * N * C * 4)                                       # live f32 temporaries headroom
        vmem_limit_bytes = int(min(64 * 2 ** 20, max(32 * 2 ** 20, 2 * est)))

    flops = B * (8 * N * C * C + 4 * N * N * C)                       # qkv + proj + per-head qk^T, attn@v
    transcendentals = B * num_heads * N * N                           # patch-softmax exps only
    bytes_accessed = (B * N * C * (in_sz + out_sz) + (3 * C * C + C * C) * w_sz
                      + C * 4 + num_heads * N * N * 4 + num_heads * 4)

    kernel = partial(gpsa_kernel, num_heads=num_heads, head_dim=head_dim,
                     scale=float(scale), batch_block=batch_block)

    out = pl.pallas_call(
        kernel,
        out_shape=jax.ShapeDtypeStruct((B, N, C), x.dtype),
        grid_spec=pltpu.PrefetchScalarGridSpec(
            num_scalar_prefetch=0,
            grid=grid,
            in_specs=[
                pl.BlockSpec((batch_block, N, C), lambda b: (b, 0, 0)),  # x: batch_block elems / step
                pl.BlockSpec((C, 3 * C), lambda b: (0, 0)),              # fused qkv weight (resident)
                pl.BlockSpec((C, C), lambda b: (0, 0)),                  # proj weight (resident)
                pl.BlockSpec((1, C), lambda b: (0, 0)),                  # proj bias
                pl.BlockSpec((num_heads, N, N), lambda b: (0, 0, 0)),    # precomputed pos softmax
                pl.BlockSpec(memory_space=pltpu.MemorySpace.SMEM),       # sigmoid(gating) (1, H)
            ],
            out_specs=pl.BlockSpec((batch_block, N, C), lambda b: (b, 0, 0)),
            scratch_shapes=[pltpu.VMEM((N, C), jnp.float32)],            # per-step head-concat buffer
        ),
        compiler_params=pltpu.CompilerParams(
            dimension_semantics=("parallel",),
            vmem_limit_bytes=vmem_limit_bytes,
        ),
        cost_estimate=pl.CostEstimate(flops=int(flops),
                                      transcendentals=int(transcendentals),
                                      bytes_accessed=int(bytes_accessed)),
    )(x_mm, wqkv_mm, w_proj_mm, b_proj2, pos_attn, gate_sig)
    return out


# ------------------------- reference / init helpers -------------------------

def trunc_normal(key, shape, std=0.02, dtype=jnp.float32):
    # matches timm trunc_normal_: truncation at +/- 2 std
    return std * jax.random.truncated_normal(key, -2.0, 2.0, shape, dtype)


def local_pos_proj_weight(num_heads, locality_strength=1.0):
    """Replicates GPSA.local_init for pos_proj.weight (shape (num_heads, 3))."""
    ks = int(num_heads ** 0.5)
    center = (ks - 1) / 2 if ks % 2 == 0 else ks // 2
    w = [[0.0, 0.0, 0.0] for _ in range(num_heads)]
    for h1 in range(ks):
        for h2 in range(ks):
            position = h1 + ks * h2
            w[position][2] = -1.0
            w[position][1] = 2.0 * (h1 - center)
            w[position][0] = 2.0 * (h2 - center)
    return jnp.asarray(w, dtype=jnp.float32) * locality_strength


def gpsa_reference(x, wqkv, w_proj, b_proj, pos_w, pos_b, gating_param, *, num_heads, scale):
    B, N, C = x.shape
    hd = C // num_heads
    hi = jax.lax.Precision.HIGHEST
    rel = get_rel_indices(N)
    qkv = jnp.einsum("bnc,cd->bnd", x, wqkv, precision=hi)
    q = qkv[..., :C].reshape(B, N, num_heads, hd).transpose(0, 2, 1, 3)
    k = qkv[..., C:2 * C].reshape(B, N, num_heads, hd).transpose(0, 2, 1, 3)
    v = qkv[..., 2 * C:].reshape(B, N, num_heads, hd).transpose(0, 2, 1, 3)
    patch = jax.nn.softmax(jnp.einsum("bhnd,bhmd->bhnm", q, k, precision=hi) * scale, axis=-1)
    pos = jnp.einsum("hf,fnm->hnm", pos_w, rel, precision=hi) + pos_b[:, None, None]
    pos = jax.nn.softmax(pos, axis=-1)
    g = jax.nn.sigmoid(gating_param)[None, :, None, None]
    attn = (1.0 - g) * patch + g * pos[None]
    attn = attn / jnp.sum(attn, axis=-1, keepdims=True)
    out = jnp.einsum("bhnm,bhmd->bhnd", attn, v, precision=hi)
    out = out.transpose(0, 2, 1, 3).reshape(B, N, C)
    return jnp.einsum("bnc,cd->bnd", out, w_proj, precision=hi) + b_proj


if __name__ == "__main__":
    # GPSA(dim=64, num_heads=4) on a 4x4 patch grid (N=16), batch 2.
    B, N, C = 2, 16, 64
    num_heads = 4
    head_dim = C // num_heads
    scale = head_dim ** -0.5
    locality_strength = 1.0

    key = jax.random.PRNGKey(0)
    kx, kq, kk, kp = jax.random.split(key, 4)

    x = jax.random.normal(kx, (B, N, C), dtype=jnp.float32)

    # Parameters replicate GPSA.__init__ + _init_weights + local_init (use_local_init=True).
    # Linear weights are stored transposed ((in, out)) so the kernel computes x @ W.
    wq = trunc_normal(kq, (C, C))                        # qk Linear (qkv_bias=False -> no bias)
    wk = trunc_normal(kk, (C, C))
    wv = jnp.eye(C, dtype=jnp.float32)                   # local_init: v.weight <- I
    wqkv = jnp.concatenate([wq, wk, wv], axis=1)         # fused (C, 3C) for one wide MXU matmul
    w_proj = trunc_normal(kp, (C, C))
    b_proj = jnp.zeros((C,), jnp.float32)
    pos_w = local_pos_proj_weight(num_heads, locality_strength)   # (H, 3)
    pos_b = jnp.zeros((num_heads,), jnp.float32)
    gating = jnp.ones((num_heads,), jnp.float32)         # gating_param

    ref = gpsa_reference(x, wqkv, w_proj, b_proj, pos_w, pos_b, gating,
                         num_heads=num_heads, scale=scale)

    # f32 matmul-operand path (default; v5e-safe).
    out = gpsa_pallas(x, wqkv, w_proj, b_proj, pos_w, pos_b, gating,
                      num_heads=num_heads, scale=scale)
    out = jax.block_until_ready(out)
    assert out.shape == (B, N, C)
    err = float(jnp.max(jnp.abs(out - ref)))
    assert jnp.allclose(out, ref, atol=3e-3, rtol=2e-2), \
        f"f32 mismatch vs reference (max abs err {err})"

    # bf16 matmul-operand path (v6e/v7x MXU); softmax / renorm math stays f32 in-kernel.
    out_bf16 = gpsa_pallas(x, wqkv, w_proj, b_proj, pos_w, pos_b, gating,
                           num_heads=num_heads, scale=scale, matmul_dtype=jnp.bfloat16)
    out_bf16 = jax.block_until_ready(out_bf16)
    err_bf16 = float(jnp.max(jnp.abs(out_bf16 - ref)))
    assert jnp.allclose(out_bf16, ref, atol=5e-2, rtol=5e-2), \
        f"bf16 mismatch vs reference (max abs err {err_bf16})"

    print("KERNEL_OK")
</pallas_src>

<mosaic_0001>
module attributes {stable_mosaic.version = 11 : i64} {
  func.func @gpsa_kernel(%arg0: i32, %arg1: memref<1x16x64xf32, #tpu.memory_space<vmem>>, %arg2: memref<64x192xf32, #tpu.memory_space<vmem>>, %arg3: memref<64x64xf32, #tpu.memory_space<vmem>>, %arg4: memref<1x64xf32, #tpu.memory_space<vmem>>, %arg5: memref<4x16x16xf32, #tpu.memory_space<vmem>>, %arg6: memref<1x4xf32, #tpu.memory_space<smem>>, %arg7: memref<1x16x64xf32, #tpu.memory_space<vmem>>, %arg8: memref<16x64xf32, #tpu.memory_space<vmem>>) attributes {dimension_semantics = [#tpu.dimension_semantics<parallel>], iteration_bounds = array<i64: 2>, scalar_prefetch = 0 : i64, scratch_operands = 1 : i64, tpu.core_type = #tpu.core_type<tc>, window_params = [{transform_indices = @transform_0, window_bounds = array<i64: 1, 16, 64>}, {pipeline_mode = #tpu.pipeline_mode<synchronous>, transform_indices = @transform_1, window_bounds = array<i64: 64, 192>}, {pipeline_mode = #tpu.pipeline_mode<synchronous>, transform_indices = @transform_2, window_bounds = array<i64: 64, 64>}, {pipeline_mode = #tpu.pipeline_mode<synchronous>, transform_indices = @transform_3, window_bounds = array<i64: 1, 64>}, {pipeline_mode = #tpu.pipeline_mode<synchronous>, transform_indices = @transform_4, window_bounds = array<i64: 4, 16, 16>}, {transform_indices = @transform_5, window_bounds = array<i64: 1, 4>}, {transform_indices = @transform_6, window_bounds = array<i64: 1, 16, 64>}]} {
    %c0 = arith.constant 0 : index
    %c0_0 = arith.constant 0 : index
    %c0_1 = arith.constant 0 : index
    %0 = vector.load %arg1[%c0, %c0_0, %c0_1] : memref<1x16x64xf32, #tpu.memory_space<vmem>>, vector<1x16x64xf32>
    %1 = vector.shape_cast %0 : vector<1x16x64xf32> to vector<16x64xf32>
    %c0_2 = arith.constant 0 : index
    %c0_3 = arith.constant 0 : index
    %2 = vector.load %arg2[%c0_2, %c0_3] : memref<64x192xf32, #tpu.memory_space<vmem>>, vector<64x192xf32>
    %cst = arith.constant dense<0.000000e+00> : vector<16x192xf32>
    %3 = tpu.matmul %1, %2, %cst {dimension_numbers = #tpu.dot_dimension_numbers<[1], [0], [0], [1], [0, 0, 1, 1], [], []>} : vector<16x64xf32>, vector<64x192xf32>, vector<16x192xf32> -> vector<16x192xf32>
    %4 = vector.extract_strided_slice %3 {offsets = [0, 0], sizes = [16, 16], strides = [1, 1]} : vector<16x192xf32> to vector<16x16xf32>
    %5 = vector.extract_strided_slice %3 {offsets = [0, 64], sizes = [16, 16], strides = [1, 1]} : vector<16x192xf32> to vector<16x16xf32>
    %6 = vector.extract_strided_slice %3 {offsets = [0, 128], sizes = [16, 16], strides = [1, 1]} : vector<16x192xf32> to vector<16x16xf32>
    %cst_4 = arith.constant dense<0.000000e+00> : vector<16x16xf32>
    %7 = tpu.matmul %4, %5, %cst_4 {dimension_numbers = #tpu.dot_dimension_numbers<[1], [1], [0], [0], [0, 0, 1, 0], [], []>} : vector<16x16xf32>, vector<16x16xf32>, vector<16x16xf32> -> vector<16x16xf32>
    %cst_5 = arith.constant 2.500000e-01 : f32
    %8 = vector.broadcast %cst_5 : f32 to vector<16x16xf32>
    %9 = arith.mulf %7, %8 : vector<16x16xf32>
    %cst_6 = arith.constant dense<0xFF800000> : vector<16xf32>
    %10 = vector.multi_reduction <maximumf>, %9, %cst_6 [1] : vector<16x16xf32> to vector<16xf32>
    %11 = vector.shape_cast %10 : vector<16xf32> to vector<16x1xf32>
    %12 = vector.broadcast %11 : vector<16x1xf32> to vector<16x16xf32>
    %13 = arith.subf %9, %12 : vector<16x16xf32>
    %14 = math.exp %13 : vector<16x16xf32>
    %cst_7 = arith.constant dense<0.000000e+00> : vector<16xf32>
    %15 = vector.multi_reduction <add>, %14, %cst_7 [1] : vector<16x16xf32> to vector<16xf32>
    %16 = vector.shape_cast %15 : vector<16xf32> to vector<16x1xf32>
    %17 = tpu.reciprocal %16 {approx = true} : vector<16x1xf32> -> vector<16x1xf32>
    %18 = vector.broadcast %17 : vector<16x1xf32> to vector<16x16xf32>
    %19 = arith.mulf %14, %18 : vector<16x16xf32>
    %c0_8 = arith.constant 0 : index
    %c0_9 = arith.constant 0 : index
    %c0_10 = arith.constant 0 : index
    %20 = vector.load %arg5[%c0_8, %c0_9, %c0_10] : memref<4x16x16xf32, #tpu.memory_space<vmem>>, vector<1x16x16xf32>
    %21 = vector.shape_cast %20 : vector<1x16x16xf32> to vector<16x16xf32>
    %c0_11 = arith.constant 0 : index
    %c0_12 = arith.constant 0 : index
    %22 = memref.load %arg6[%c0_11, %c0_12] : memref<1x4xf32, #tpu.memory_space<smem>>
    %23 = arith.subf %21, %19 : vector<16x16xf32>
    %24 = vector.broadcast %22 : f32 to vector<16x16xf32>
    %25 = arith.mulf %24, %23 : vector<16x16xf32>
    %26 = arith.addf %19, %25 : vector<16x16xf32>
    %cst_13 = arith.constant dense<0.000000e+00> : vector<16xf32>
    %27 = vector.multi_reduction <add>, %26, %cst_13 [1] : vector<16x16xf32> to vector<16xf32>
    %28 = vector.shape_cast %27 : vector<16xf32> to vector<16x1xf32>
    %29 = tpu.reciprocal %28 {approx = true} : vector<16x1xf32> -> vector<16x1xf32>
    %30 = vector.broadcast %29 : vector<16x1xf32> to vector<16x16xf32>
    %31 = arith.mulf %26, %30 : vector<16x16xf32>
    %cst_14 = arith.constant dense<0.000000e+00> : vector<16x16xf32>
    %32 = tpu.matmul %31, %6, %cst_14 {dimension_numbers = #tpu.dot_dimension_numbers<[1], [0], [0], [1], [0, 0, 1, 1], [], []>} : vector<16x16xf32>, vector<16x16xf32>, vector<16x16xf32> -> vector<16x16xf32>
    %c0_15 = arith.constant 0 : index
    %c0_16 = arith.constant 0 : index
    %33 = vector.load %arg8[%c0_15, %c0_16] : memref<16x64xf32, #tpu.memory_space<vmem>>, vector<16x16xf32>
    tpu.vector_store %arg8[%c0_15, %c0_16], %32 {strides = array<i32>} : memref<16x64xf32, #tpu.memory_space<vmem>>, vector<16x16xf32>,
    %34 = vector.extract_strided_slice %3 {offsets = [0, 16], sizes = [16, 16], strides = [1, 1]} : vector<16x192xf32> to vector<16x16xf32>
    %35 = vector.extract_strided_slice %3 {offsets = [0, 80], sizes = [16, 16], strides = [1, 1]} : vector<16x192xf32> to vector<16x16xf32>
    %36 = vector.extract_strided_slice %3 {offsets = [0, 144], sizes = [16, 16], strides = [1, 1]} : vector<16x192xf32> to vector<16x16xf32>
    %cst_17 = arith.constant dense<0.000000e+00> : vector<16x16xf32>
    %37 = tpu.matmul %34, %35, %cst_17 {dimension_numbers = #tpu.dot_dimension_numbers<[1], [1], [0], [0], [0, 0, 1, 0], [], []>} : vector<16x16xf32>, vector<16x16xf32>, vector<16x16xf32> -> vector<16x16xf32>
    %cst_18 = arith.constant 2.500000e-01 : f32
    %38 = vector.broadcast %cst_18 : f32 to vector<16x16xf32>
    %39 = arith.mulf %37, %38 : vector<16x16xf32>
    %cst_19 = arith.constant dense<0xFF800000> : vector<16xf32>
    %40 = vector.multi_reduction <maximumf>, %39, %cst_19 [1] : vector<16x16xf32> to vector<16xf32>
    %41 = vector.shape_cast %40 : vector<16xf32> to vector<16x1xf32>
    %42 = vector.broadcast %41 : vector<16x1xf32> to vector<16x16xf32>
    %43 = arith.subf %39, %42 : vector<16x16xf32>
    %44 = math.exp %43 : vector<16x16xf32>
    %cst_20 = arith.constant dense<0.000000e+00> : vector<16xf32>
    %45 = vector.multi_reduction <add>, %44, %cst_20 [1] : vector<16x16xf32> to vector<16xf32>
    %46 = vector.shape_cast %45 : vector<16xf32> to vector<16x1xf32>
    %47 = tpu.reciprocal %46 {approx = true} : vector<16x1xf32> -> vector<16x1xf32>
    %48 = vector.broadcast %47 : vector<16x1xf32> to vector<16x16xf32>
    %49 = arith.mulf %44, %48 : vector<16x16xf32>
    %c1 = arith.constant 1 : index
    %c0_21 = arith.constant 0 : index
    %c0_22 = arith.constant 0 : index
    %50 = vector.load %arg5[%c1, %c0_21, %c0_22] : memref<4x16x16xf32, #tpu.memory_space<vmem>>, vector<1x16x16xf32>
    %51 = vector.shape_cast %50 : vector<1x16x16xf32> to vector<16x16xf32>
    %c0_23 = arith.constant 0 : index
    %c1_24 = arith.constant 1 : index
    %52 = memref.load %arg6[%c0_23, %c1_24] : memref<1x4xf32, #tpu.memory_space<smem>>
    %53 = arith.subf %51, %49 : vector<16x16xf32>
    %54 = vector.broadcast %52 : f32 to vector<16x16xf32>
    %55 = arith.mulf %54, %53 : vector<16x16xf32>
    %56 = arith.addf %49, %55 : vector<16x16xf32>
    %cst_25 = arith.constant dense<0.000000e+00> : vector<16xf32>
    %57 = vector.multi_reduction <add>, %56, %cst_25 [1] : vector<16x16xf32> to vector<16xf32>
    %58 = vector.shape_cast %57 : vector<16xf32> to vector<16x1xf32>
    %59 = tpu.reciprocal %58 {approx = true} : vector<16x1xf32> -> vector<16x1xf32>
    %60 = vector.broadcast %59 : vector<16x1xf32> to vector<16x16xf32>
    %61 = arith.mulf %56, %60 : vector<16x16xf32>
    %cst_26 = arith.constant dense<0.000000e+00> : vector<16x16xf32>
    %62 = tpu.matmul %61, %36, %cst_26 {dimension_numbers = #tpu.dot_dimension_numbers<[1], [0], [0], [1], [0, 0, 1, 1], [], []>} : vector<16x16xf32>, vector<16x16xf32>, vector<16x16xf32> -> vector<16x16xf32>
    %c0_27 = arith.constant 0 : index
    %c16 = arith.constant 16 : index
    %63 = vector.load %arg8[%c0_27, %c16] : memref<16x64xf32, #tpu.memory_space<vmem>>, vector<16x16xf32>
    tpu.vector_store %arg8[%c0_27, %c16], %62 {strides = array<i32>} : memref<16x64xf32, #tpu.memory_space<vmem>>, vector<16x16xf32>,
    %64 = vector.extract_strided_slice %3 {offsets = [0, 32], sizes = [16, 16], strides = [1, 1]} : vector<16x192xf32> to vector<16x16xf32>
    %65 = vector.extract_strided_slice %3 {offsets = [0, 96], sizes = [16, 16], strides = [1, 1]} : vector<16x192xf32> to vector<16x16xf32>
    %66 = vector.extract_strided_slice %3 {offsets = [0, 160], sizes = [16, 16], strides = [1, 1]} : vector<16x192xf32> to vector<16x16xf32>
    %cst_28 = arith.constant dense<0.000000e+00> : vector<16x16xf32>
    %67 = tpu.matmul %64, %65, %cst_28 {dimension_numbers = #tpu.dot_dimension_numbers<[1], [1], [0], [0], [0, 0, 1, 0], [], []>} : vector<16x16xf32>, vector<16x16xf32>, vector<16x16xf32> -> vector<16x16xf32>
    %cst_29 = arith.constant 2.500000e-01 : f32
    %68 = vector.broadcast %cst_29 : f32 to vector<16x16xf32>
    %69 = arith.mulf %67, %68 : vector<16x16xf32>
    %cst_30 = arith.constant dense<0xFF800000> : vector<16xf32>
    %70 = vector.multi_reduction <maximumf>, %69, %cst_30 [1] : vector<16x16xf32> to vector<16xf32>
    %71 = vector.shape_cast %70 : vector<16xf32> to vector<16x1xf32>
    %72 = vector.broadcast %71 : vector<16x1xf32> to vector<16x16xf32>
    %73 = arith.subf %69, %72 : vector<16x16xf32>
    %74 = math.exp %73 : vector<16x16xf32>
    %cst_31 = arith.constant dense<0.000000e+00> : vector<16xf32>
    %75 = vector.multi_reduction <add>, %74, %cst_31 [1] : vector<16x16xf32> to vector<16xf32>
    %76 = vector.shape_cast %75 : vector<16xf32> to vector<16x1xf32>
    %77 = tpu.reciprocal %76 {approx = true} : vector<16x1xf32> -> vector<16x1xf32>
    %78 = vector.broadcast %77 : vector<16x1xf32> to vector<16x16xf32>
    %79 = arith.mulf %74, %78 : vector<16x16xf32>
    %c2 = arith.constant 2 : index
    %c0_32 = arith.constant 0 : index
    %c0_33 = arith.constant 0 : index
    %80 = vector.load %arg5[%c2, %c0_32, %c0_33] : memref<4x16x16xf32, #tpu.memory_space<vmem>>, vector<1x16x16xf32>
    %81 = vector.shape_cast %80 : vector<1x16x16xf32> to vector<16x16xf32>
    %c0_34 = arith.constant 0 : index
    %c2_35 = arith.constant 2 : index
    %82 = memref.load %arg6[%c0_34, %c2_35] : memref<1x4xf32, #tpu.memory_space<smem>>
    %83 = arith.subf %81, %79 : vector<16x16xf32>
    %84 = vector.broadcast %82 : f32 to vector<16x16xf32>
    %85 = arith.mulf %84, %83 : vector<16x16xf32>
    %86 = arith.addf %79, %85 : vector<16x16xf32>
    %cst_36 = arith.constant dense<0.000000e+00> : vector<16xf32>
    %87 = vector.multi_reduction <add>, %86, %cst_36 [1] : vector<16x16xf32> to vector<16xf32>
    %88 = vector.shape_cast %87 : vector<16xf32> to vector<16x1xf32>
    %89 = tpu.reciprocal %88 {approx = true} : vector<16x1xf32> -> vector<16x1xf32>
    %90 = vector.broadcast %89 : vector<16x1xf32> to vector<16x16xf32>
    %91 = arith.mulf %86, %90 : vector<16x16xf32>
    %cst_37 = arith.constant dense<0.000000e+00> : vector<16x16xf32>
    %92 = tpu.matmul %91, %66, %cst_37 {dimension_numbers = #tpu.dot_dimension_numbers<[1], [0], [0], [1], [0, 0, 1, 1], [], []>} : vector<16x16xf32>, vector<16x16xf32>, vector<16x16xf32> -> vector<16x16xf32>
    %c0_38 = arith.constant 0 : index
    %c32 = arith.constant 32 : index
    %93 = vector.load %arg8[%c0_38, %c32] : memref<16x64xf32, #tpu.memory_space<vmem>>, vector<16x16xf32>
    tpu.vector_store %arg8[%c0_38, %c32], %92 {strides = array<i32>} : memref<16x64xf32, #tpu.memory_space<vmem>>, vector<16x16xf32>,
    %94 = vector.extract_strided_slice %3 {offsets = [0, 48], sizes = [16, 16], strides = [1, 1]} : vector<16x192xf32> to vector<16x16xf32>
    %95 = vector.extract_strided_slice %3 {offsets = [0, 112], sizes = [16, 16], strides = [1, 1]} : vector<16x192xf32> to vector<16x16xf32>
    %96 = vector.extract_strided_slice %3 {offsets = [0, 176], sizes = [16, 16], strides = [1, 1]} : vector<16x192xf32> to vector<16x16xf32>
    %cst_39 = arith.constant dense<0.000000e+00> : vector<16x16xf32>
    %97 = tpu.matmul %94, %95, %cst_39 {dimension_numbers = #tpu.dot_dimension_numbers<[1], [1], [0], [0], [0, 0, 1, 0], [], []>} : vector<16x16xf32>, vector<16x16xf32>, vector<16x16xf32> -> vector<16x16xf32>
    %cst_40 = arith.constant 2.500000e-01 : f32
    %98 = vector.broadcast %cst_40 : f32 to vector<16x16xf32>
    %99 = arith.mulf %97, %98 : vector<16x16xf32>
    %cst_41 = arith.constant dense<0xFF800000> : vector<16xf32>
    %100 = vector.multi_reduction <maximumf>, %99, %cst_41 [1] : vector<16x16xf32> to vector<16xf32>
    %101 = vector.shape_cast %100 : vector<16xf32> to vector<16x1xf32>
    %102 = vector.broadcast %101 : vector<16x1xf32> to vector<16x16xf32>
    %103 = arith.subf %99, %102 : vector<16x16xf32>
    %104 = math.exp %103 : vector<16x16xf32>
    %cst_42 = arith.constant dense<0.000000e+00> : vector<16xf32>
    %105 = vector.multi_reduction <add>, %104, %cst_42 [1] : vector<16x16xf32> to vector<16xf32>
    %106 = vector.shape_cast %105 : vector<16xf32> to vector<16x1xf32>
    %107 = tpu.reciprocal %106 {approx = true} : vector<16x1xf32> -> vector<16x1xf32>
    %108 = vector.broadcast %107 : vector<16x1xf32> to vector<16x16xf32>
    %109 = arith.mulf %104, %108 : vector<16x16xf32>
    %c3 = arith.constant 3 : index
    %c0_43 = arith.constant 0 : index
    %c0_44 = arith.constant 0 : index
    %110 = vector.load %arg5[%c3, %c0_43, %c0_44] : memref<4x16x16xf32, #tpu.memory_space<vmem>>, vector<1x16x16xf32>
    %111 = vector.shape_cast %110 : vector<1x16x16xf32> to vector<16x16xf32>
    %c0_45 = arith.constant 0 : index
    %c3_46 = arith.constant 3 : index
    %112 = memref.load %arg6[%c0_45, %c3_46] : memref<1x4xf32, #tpu.memory_space<smem>>
    %113 = arith.subf %111, %109 : vector<16x16xf32>
    %114 = vector.broadcast %112 : f32 to vector<16x16xf32>
    %115 = arith.mulf %114, %113 : vector<16x16xf32>
    %116 = arith.addf %109, %115 : vector<16x16xf32>
    %cst_47 = arith.constant dense<0.000000e+00> : vector<16xf32>
    %117 = vector.multi_reduction <add>, %116, %cst_47 [1] : vector<16x16xf32> to vector<16xf32>
    %118 = vector.shape_cast %117 : vector<16xf32> to vector<16x1xf32>
    %119 = tpu.reciprocal %118 {approx = true} : vector<16x1xf32> -> vector<16x1xf32>
    %120 = vector.broadcast %119 : vector<16x1xf32> to vector<16x16xf32>
    %121 = arith.mulf %116, %120 : vector<16x16xf32>
    %cst_48 = arith.constant dense<0.000000e+00> : vector<16x16xf32>
    %122 = tpu.matmul %121, %96, %cst_48 {dimension_numbers = #tpu.dot_dimension_numbers<[1], [0], [0], [1], [0, 0, 1, 1], [], []>} : vector<16x16xf32>, vector<16x16xf32>, vector<16x16xf32> -> vector<16x16xf32>
    %c0_49 = arith.constant 0 : index
    %c48 = arith.constant 48 : index
    %123 = vector.load %arg8[%c0_49, %c48] : memref<16x64xf32, #tpu.memory_space<vmem>>, vector<16x16xf32>
    tpu.vector_store %arg8[%c0_49, %c48], %122 {strides = array<i32>} : memref<16x64xf32, #tpu.memory_space<vmem>>, vector<16x16xf32>,
    %c0_50 = arith.constant 0 : index
    %c0_51 = arith.constant 0 : index
    %124 = vector.load %arg8[%c0_50, %c0_51] : memref<16x64xf32, #tpu.memory_space<vmem>>, vector<16x64xf32>
    %c0_52 = arith.constant 0 : index
    %c0_53 = arith.constant 0 : index
    %125 = vector.load %arg3[%c0_52, %c0_53] : memref<64x64xf32, #tpu.memory_space<vmem>>, vector<64x64xf32>
    %cst_54 = arith.constant dense<0.000000e+00> : vector<16x64xf32>
    %126 = tpu.matmul %124, %125, %cst_54 {dimension_numbers = #tpu.dot_dimension_numbers<[1], [0], [0], [1], [0, 0, 1, 1], [], []>} : vector<16x64xf32>, vector<64x64xf32>, vector<16x64xf32> -> vector<16x64xf32>
    %c0_55 = arith.constant 0 : index
    %c0_56 = arith.constant 0 : index
    %127 = vector.load %arg4[%c0_55, %c0_56] : memref<1x64xf32, #tpu.memory_space<vmem>>, vector<1x64xf32>
    %128 = vector.broadcast %127 : vector<1x64xf32> to vector<16x64xf32>
    %129 = arith.addf %126, %128 : vector<16x64xf32>
    %c0_57 = arith.constant 0 : index
    %c0_58 = arith.constant 0 : index
    %c0_59 = arith.constant 0 : index
    %130 = vector.load %arg7[%c0_57, %c0_58, %c0_59] : memref<1x16x64xf32, #tpu.memory_space<vmem>>, vector<1x16x64xf32>
    %131 = vector.shape_cast %130 : vector<1x16x64xf32> to vector<16x64xf32>
    %132 = vector.shape_cast %129 : vector<16x64xf32> to vector<1x16x64xf32>
    tpu.vector_store %arg7[%c0_57, %c0_58, %c0_59], %132 {strides = array<i32>} : memref<1x16x64xf32, #tpu.memory_space<vmem>>, vector<1x16x64xf32>,
    return
  }
  func.func @transform_0(%arg0: i32) -> (i32, i32, i32) {
    %c0_i32 = arith.constant 0 : i32
    %c0_i32_0 = arith.constant 0 : i32
    %c0_i32_1 = arith.constant 0 : i32
    return %arg0, %c0_i32, %c0_i32_0 : i32, i32, i32
  }
  func.func @transform_1(%arg0: i32) -> (i32, i32) {
    %c0_i32 = arith.constant 0 : i32
    %c0_i32_0 = arith.constant 0 : i32
    %c0_i32_1 = arith.constant 0 : i32
    return %c0_i32, %c0_i32_0 : i32, i32
  }
  func.func @transform_2(%arg0: i32) -> (i32, i32) {
    %c0_i32 = arith.constant 0 : i32
    %c0_i32_0 = arith.constant 0 : i32
    %c0_i32_1 = arith.constant 0 : i32
    return %c0_i32, %c0_i32_0 : i32, i32
  }
  func.func @transform_3(%arg0: i32) -> (i32, i32) {
    %c0_i32 = arith.constant 0 : i32
    %c0_i32_0 = arith.constant 0 : i32
    %c0_i32_1 = arith.constant 0 : i32
    return %c0_i32, %c0_i32_0 : i32, i32
  }
  func.func @transform_4(%arg0: i32) -> (i32, i32, i32) {
    %c0_i32 = arith.constant 0 : i32
    %c0_i32_0 = arith.constant 0 : i32
    %c0_i32_1 = arith.constant 0 : i32
    %c0_i32_2 = arith.constant 0 : i32
    return %c0_i32, %c0_i32_0, %c0_i32_1 : i32, i32, i32
  }
  func.func @transform_5(%arg0: i32) -> (i32, i32) {
    %c0_i32 = arith.constant 0 : i32
    %c0_i32_0 = arith.constant 0 : i32
    %c0_i32_1 = arith.constant 0 : i32
    return %c0_i32, %c0_i32_0 : i32, i32
  }
  func.func @transform_6(%arg0: i32) -> (i32, i32, i32) {
    %c0_i32 = arith.constant 0 : i32
    %c0_i32_0 = arith.constant 0 : i32
    %c0_i32_1 = arith.constant 0 : i32
    return %arg0, %c0_i32, %c0_i32_0 : i32, i32, i32
  }
}

</mosaic_0001>

<bundles_post_ra>
// kernel: tpu_custom_call.1
= control target key start
LH: loop header
LB: loop body
LE: loop exit
PB: predicated region body
PF: predicated region fallthrough
CT: control target
= control target key end

     0   :  { %s2679_s0 = inlined_call_operand.hbm [shape: f32[2,16,64], index: 0, kind: input, shape index: {}]   ;;  %s2680_s1 = inlined_call_operand.hbm [shape: f32[64,192], index: 1, kind: input, shape index: {}]   ;;  %s2681_s2 = inlined_call_operand.hbm [shape: f32[64,64], index: 2, kind: input, shape index: {}]   ;;  %s2682_s3 = inlined_call_operand.vmem [shape: f32[1,64], index: 3, kind: input, shape index: {}]   ;;  %s2683_s4 = inlined_call_operand.hbm [shape: f32[4,16,16], index: 4, kind: input, shape index: {}]   ;;  %s2684_s5 = inlined_call_operand.vmem [shape: f32[1,4], index: 5, kind: input, shape index: {}]   ;;  %s2685_s6 = inlined_call_operand.hbm [shape: f32[2,16,64], index: 6, kind: output, shape index: {}]  }
   0x1   :  { %2689 = sst [smem:[#allocation19_spill]] %s2680_s1 }
   0x2   :  { %11 = vsyncpa [#allocation4], 0 }
   0x3   :  { %13 = vsyncpa [#allocation4 + $0x1], 0 }
   0x4   :  { %14 = vsyncpa [#allocation8], 0 }
   0x5   :  { %15 = vsyncpa [#allocation11], 0 }
   0x6   :  { %16 = vsyncpa [#allocation6], 0 }
   0x7   :  { %17 = vsyncpa [#allocation5], 0 }
   0x8   :  { %19 = vsyncpa [#allocation5 + $0x1], 0  ;;  %s2272_s21 = smov 0   ;;  %s2274_s22 = smov 0  }
   0x9   :  { %s2276_s23 = smov 0   ;;  %s2278_s24 = smov 0  }
   0xa LB: > { %s2293_s25 = sadd.s32 4294967295, %s2215_s24   ;;  %s1579_s26 = sadd.s32 4294967294, %s2215_s24   ;;  %s2215_s24 = sphi %s2278_s24, %s2714_s24   ;;  %s2211_s23 = sphi %s2276_s23, %s2713_s23   ;;  %s2207_s22 = sphi %s2274_s22, %s2712_s22   ;;  %s2203_s21 = sphi %s2272_s21, %s2711_s21  }
   0xb   : > { %p45_p0 = scmp.ne.s32.totalorder %s2207_s22, %s2203_s21  ;;  %p2686_p1 = scmp.eq.s32.totalorder %s2293_s25, 0 }
   0xc   : > { %p180_p3 = scmp.eq.s32.totalorder %s1579_s26, 1  ;;  %p1580_p5 = scmp.ge.s32.totalorder %s2215_s24, 1 }
   0xd   : > { %p2302_p4 = por %p2686_p1, %p45_p0  ;;  %p187_p7 = scmp.lt.s32.totalorder %s2215_s24, 3 }
   0xe   : > { %p2307_p6 = por %p180_p3, %p45_p0  ;;  %s2217_s30 = smov [#allocation7]  }
   0xf   : > { %s2690_s27 = scalar_select %p2302_p4, 1, 0 }
  0x10   : > { %s2691_s28 = scalar_select %p2307_p6, 1, 0 }
  0x11   : > { %p2312_p8 = pnand %p1580_p5, %p187_p7  ;;  %s199_s7 = sshll.u32 %s2217_s30, 4  ;;  %s2316_s7 = int_to_ptr.vmem [resolvable:$true] %s199_s7 }
  0x12   : > { %s2218_s9 = smov [#allocation9]   ;;  %s2694_s1 = sld [smem:[#allocation19_spill]] }
  0x13   : > { %s2692_s29 = scalar_select %p2312_p8, 1, 0 }
  0x14   : > { %p1844_p9 = pneg %p2312_p8  ;;  %s212_s10 = sshll.u32 %s2218_s9, 4  ;;  %s2327_s10 = int_to_ptr.vmem [resolvable:$true] %s212_s10 }
  0x16   : > { %p2323_p11 = pnand %p1844_p9, %p2686_p1 }
  0x18   : > { %s2008_s13 = scalar_lea.hbm %s2694_s1, 2048  ;;  %p2337_p13 = pneg %p2323_p11 }
  0x19   : > { %p2009_p12 = scmp.ne.s32.totalorder %s2694_s1, %s2008_s13  ;;  %p2015_p5 = scmp.lt.u32.totalorder %s2008_s13, %s2694_s1 }
  0x1b   : > { %p2011_p0 = pnand %p2337_p13, %p2009_p12 }
  0x1d   : > { %p2012_p3 = pneg %p2011_p0 }
  0x1f   : > { %p2017_p7 = pnand %p2015_p5, %p2012_p3 }
  0x21   : > { %2020 = shalt.err (!%p2017_p7)
}
  0x22   : > { %s2021_s19 = scalar_lea.vmem %s2316_s7, 2048  ;;  %p2029_p2 = scmp.lt.s32.totalorder %s2316_s7, %s2316_s7 }
  0x23   : > { %p2022_p9 = scmp.ne.s32.totalorder %s2316_s7, %s2021_s19  ;;  %p2030_p6 = scmp.lt.s32.totalorder %s2021_s19, %s2021_s19 }
  0x25   : > { %p2024_p10 = pnand %p2022_p9, %p2337_p13  ;;  %p2031_p12 = por %p2030_p6, %p2029_p2 }
  0x27   : > { %p2025_p1 = pneg %p2024_p10 }
  0x29   : > { %p2032_p0 = pnand %p2031_p12, %p2025_p1 }
  0x2b   : > { %2035 = shalt.err (!%p2032_p0)
}
  0x2c   : > { %s2219_s20 = smov 256   ;;  %s2220_s26 = smov 16  }
  0x2d   : > { %1847 = dma.hbm_to_vmem [thread:$0]  (!%p2323_p11), %s2694_s1, 2048, %s2316_s7, [#allocation8], %s2219_s20, %s2219_s20, %s2220_s26  }
  0x2e   : > { %s2036_s13 = scalar_lea.hbm %s2681_s2, 1024 }
  0x2f   : > { %p2037_p2 = scmp.ne.s32.totalorder %s2681_s2, %s2036_s13  ;;  %p2043_p10 = scmp.lt.u32.totalorder %s2036_s13, %s2681_s2 }
  0x31   : > { %p2039_p1 = pnand %p2037_p2, %p2337_p13 }
  0x33   : > { %p2040_p6 = pneg %p2039_p1 }
  0x35   : > { %p2045_p3 = pnand %p2043_p10, %p2040_p6 }
  0x37   : > { %2048 = shalt.err (!%p2045_p3)
}
  0x38   : > { %s2049_s7 = scalar_lea.vmem %s2327_s10, 1024  ;;  %p2057_p12 = scmp.lt.s32.totalorder %s2327_s10, %s2327_s10 }
  0x39   : > { %p2050_p5 = scmp.ne.s32.totalorder %s2327_s10, %s2049_s7  ;;  %p2058_p0 = scmp.lt.s32.totalorder %s2049_s7, %s2049_s7 }
  0x3b   : > { %p2052_p7 = pnand %p2050_p5, %p2337_p13  ;;  %p2059_p2 = por %p2058_p0, %p2057_p12 }
  0x3d   : > { %p2053_p9 = pneg %p2052_p7 }
  0x3f   : > { %p2060_p1 = pnand %p2059_p2, %p2053_p9 }
  0x41   : > { %2063 = shalt.err (!%p2060_p1)
}
  0x42   : > { %s2221_s19 = smov 128   ;;  %s2222_s20 = smov 8  }
  0x43   : > { %1850 = dma.hbm_to_vmem [thread:$0]  (!%p2323_p11), %s2681_s2, 1024, %s2327_s10, [#allocation8], %s2221_s19, %s2221_s19, %s2222_s20  }
  0x44   : > { %s242_s12 = sshll.u32 %s2684_s5, 4  ;;  %s2223_s13 = smov [#allocation10]   ;;  %s2387_s12 = int_to_ptr.vmem [resolvable:$true] %s242_s12 }
  0x45   : > { %s228_s14 = sshll.u32 %s2223_s13, 4  ;;  %s2064_s18 = scalar_lea.hbm %s2683_s4, 1024  ;;  %s229_s14 = int_to_ptr.vmem [resolvable:$true] %s228_s14 }
  0x46   : > { %p2065_p6 = scmp.ne.s32.totalorder %s2683_s4, %s2064_s18  ;;  %p2071_p5 = scmp.lt.u32.totalorder %s2064_s18, %s2683_s4 }
  0x48   : > { %p2067_p10 = pnand %p2065_p6, %p2337_p13 }
  0x4a   : > { %p2068_p3 = pneg %p2067_p10 }
  0x4c   : > { %p2073_p7 = pnand %p2071_p5, %p2068_p3 }
  0x4e   : > { %2076 = shalt.err (!%p2073_p7)
}
  0x4f   : > { %s2077_s30 = scalar_lea.vmem %s229_s14, 1024  ;;  %p2085_p2 = scmp.lt.s32.totalorder %s229_s14, %s229_s14 }
  0x50   : > { %p2078_p9 = scmp.ne.s32.totalorder %s229_s14, %s2077_s30  ;;  %p2086_p1 = scmp.lt.s32.totalorder %s2077_s30, %s2077_s30 }
  0x52   : > { %p2080_p12 = pnand %p2078_p9, %p2337_p13  ;;  %p2087_p4 = por %p2086_p1, %p2085_p2 }
  0x54   : > { %p2081_p0 = pneg %p2080_p12 }
  0x56   : > { %p2088_p8 = pnand %p2087_p4, %p2081_p0 }
  0x58   : > { %2091 = shalt.err (!%p2088_p8)
}
  0x59   : > { %1853 = dma.hbm_to_vmem [thread:$0]  (!%p2323_p11), %s2683_s4, 1024, %s229_s14, [#allocation11], %s2221_s19, %s2221_s19, %s2222_s20  }
  0x5a   : > { %s2092_s11 = scalar_lea.vmem %s2387_s12, 16  ;;  %p2100_p4 = scmp.lt.s32.totalorder %s2387_s12, %s2387_s12 }
  0x5b   : > { %p2093_p6 = scmp.ne.s32.totalorder %s2387_s12, %s2092_s11  ;;  %p2101_p8 = scmp.lt.s32.totalorder %s2092_s11, %s2092_s11 }
  0x5d   : > { %p2095_p10 = pnand %p2093_p6, %p2337_p13  ;;  %p2102_p5 = por %p2101_p8, %p2100_p4 }
  0x5f   : > { %p2096_p3 = pneg %p2095_p10 }
  0x61   : > { %p2103_p7 = pnand %p2102_p5, %p2096_p3 }
  0x63   : > { %2106 = shalt.err (!%p2103_p7)
}
  0x64   : > { %s2224_s13 = smov [#allocation12]   ;;  %s2420_s16 = sadd.s32 1, %s2215_s24  }
  0x65   : > { %1856 = dma.vmem_to_smem (!%p2323_p11), %s2387_s12, 16, %s2224_s13, [#allocation6]  }
  0x66   : > { %s29_s14 = ssub.s32 %s2215_s24, %s2420_s16  ;;  %s32_s15 = sadd.s32 1, %s2211_s23 }
  0x67   : > { %p30_p13 = scmp.eq.s32.totalorder %s29_s14, 0  ;;  %p39_p9 = scmp.ne.s32.totalorder %s2211_s23, %s2207_s22 }
  0x68   : > { %p40_p12 = scmp.eq.s32.totalorder %s2215_s24, 0  ;;  %p2696_p2 = scmp.eq.s32.totalorder %s2293_s25, 1 }
  0x69   : > { %s2429_s8 = scalar_select %p30_p13, %s2211_s23, %s32_s15  }
  0x6a   : > { %p41_p0 = por %p40_p12, %p39_p9  ;;  %p2433_p1 = por %p2696_p2, %p39_p9 }
  0x6b   : > { %p1869_p6 = scmp.lt.s32.totalorder %s2215_s24, 2  ;;  %s253_s18 = sand.u32 1, %s2211_s23  }
  0x6c   : > { %s1586_s7 = sshll.u32 %s253_s18, 4  ;;  %s1633_s12 = sshll.u32 %s2215_s24, 8 }
  0x6d   : > { %s2443_s30 = scalar_lea.hbm %s2679_s0, %s1633_s12  ;;  %s257_s1 = scalar_lea.vmem [#allocation3], %s1586_s7 }
  0x6e   : > { %s264_s9 = sshll.u32 %s257_s1, 4  ;;  %p2447_p11 = pnand %p1869_p6, %p41_p0  ;;  %s2445_s9 = int_to_ptr.vmem [resolvable:$true] %s264_s9 }
  0x6f   : > { %s2451_s13 = scalar_lea.sflag [#allocation4], %s253_s18  ;;  %s2107_s14 = scalar_lea.hbm %s2443_s30, 256 }
  0x70   : > { %p2108_p10 = scmp.ne.s32.totalorder %s2443_s30, %s2107_s14  ;;  %p2109_p3 = pneg %p2447_p11 }
  0x71   : > { %s2112_s12 = scalar_lea.hbm %s2679_s0, 512  ;;  %p2113_p5 = scmp.lt.u32.totalorder %s2443_s30, %s2679_s0 }
  0x72   : > { %p2110_p4 = pnand %p2109_p3, %p2108_p10  ;;  %p2114_p7 = scmp.lt.u32.totalorder %s2112_s12, %s2107_s14 }
  0x73   : > { %p2116_p9 = scmp.lt.u32.totalorder %s2107_s14, %s2443_s30 }
  0x74   : > { %p2111_p8 = pneg %p2110_p4  ;;  %p2115_p13 = por %p2114_p7, %p2113_p5 }
  0x76   : > { %p2117_p12 = por %p2116_p9, %p2115_p13 }
  0x78   : > { %p2118_p0 = pnand %p2117_p12, %p2111_p8 }
  0x7a   : > { %2121 = shalt.err (!%p2118_p0)
}
  0x7b   : > { %s2122_s18 = scalar_lea.vmem %s2445_s9, 256  ;;  %s2225_s1 = smov [#allocation3]  }
  0x7c   : > { %p2123_p2 = scmp.ne.s32.totalorder %s2445_s9, %s2122_s18  ;;  %s2127_s15 = sshll.u32 %s2225_s1, 4  ;;  %s2128_s15 = int_to_ptr.vmem [resolvable:$false] %s2127_s15 }
  0x7d   : > { %s2129_s7 = scalar_lea.vmem %s2128_s15, 512  ;;  %p2130_p4 = scmp.lt.s32.totalorder %s2445_s9, %s2128_s15 }
  0x7e   : > { %p2125_p6 = pnand %p2123_p2, %p2109_p3  ;;  %p2131_p5 = scmp.lt.s32.totalorder %s2129_s7, %s2122_s18 }
  0x80   : > { %p2126_p10 = pneg %p2125_p6  ;;  %p2132_p7 = por %p2131_p5, %p2130_p4 }
  0x82   : > { %p2133_p13 = pnand %p2132_p7, %p2126_p10 }
  0x84   : > { %2136 = shalt.err (!%p2133_p13)
}
  0x85   : > { %1860 = dma.hbm_to_vmem [thread:$0]  (!%p2447_p11), %s2443_s30, 256, %s2445_s9, %s2451_s13, %s2221_s19, %s2221_s19, %s2222_s20  }
  0x86   : > { %p2699_p3 = scmp.ne.s32.totalorder %s2692_s29, 0 }
  0x87   : > { %s2485_s14 = sand.u32 (!%p2699_p3), 1, %s2207_s22   ;;  %p2700_p8 = scmp.ne.s32.totalorder (!%p2699_p3), %s2690_s27, 0 }
  0x88   : > { %276 = sbr.rel (%p2699_p3) target bundleno = 3205 (0xc85), region = 44  ;;  %s1590_s12 = sshll.u32 (!%p2699_p3), %s2485_s14, 4 }
  0x89   : > { %s279_s10 = scalar_lea.sflag (!%p2699_p3), [#allocation4], %s2485_s14  ;;  %s2491_s11 = scalar_lea.vmem (!%p2699_p3), [#allocation3], %s1590_s12 }
  0x8f   : > { %2182 = dma.done.wait (%p2700_p8), %s279_s10, 256  }
  0x90   : > { %2184 = vsyncadd (%p2700_p8), %s279_s10, 4294967040  ;;  %p2701_p11 = scmp.eq.s32.totalorder %s2293_s25, 0 }
  0x92   : > { %2186 = dma.done.wait (%p2701_p11), [#allocation8], 3072   ;;  %p2702_p9 = pmov %p2701_p11 }
  0x94   : > { %2188 = vsyncadd (%p2702_p9), [#allocation8], 4294964224  ;;  %p2703_p12 = pmov %p2702_p9 }
  0x95   : > { %p2704_p0 = pmov %p2702_p9 }
  0x96   : > { %2190 = dma.done.wait (%p2703_p12), [#allocation11], 1024  }
  0x97   : > { %2192 = vsyncadd (%p2704_p0), [#allocation11], 4294966272  ;;  %p2705_p2 = pmov %p2704_p0 }
  0x98   : > { %p2706_p6 = pmov %p2704_p0 }
  0x99   : > { %2194 = dma.done.wait (%p2705_p2), [#allocation6], 16  }
  0x9a   : > { %2196 = vsyncadd (%p2706_p6), [#allocation6], 4294967280 }
  0x9b   : > { %303 = sfence }
  0x9c   : > { %v331_v0 = vld [vmem:[#allocation7 + $0x8] sm:$0xff]  ;;  %v333_v1 = vld [vmem:[#allocation7 + $0x18] sm:$0xff]  ;;  %v330_v2 = vld [vmem:[#allocation7] sm:$0xff]  ;;  %v2226_v7 = vmov 0.0   ;;  %vm346_vm0 = vcmask 523264   ;;  %vm436_vm1 = vcmask 130048  }
  0x9d   : > { %v1752_v3 = vpack.c.bf16 %v333_v1, %v331_v0  ;;  %v332_v4 = vld [vmem:[#allocation7 + $0x10] sm:$0xff]  ;;  %v335_v5 = vld [vmem:[#allocation7 + $0x28] sm:$0xff]  ;;  %v337_v6 = vld [vmem:[#allocation7 + $0x38] sm:$0xff]  ;;  %417 = vmatprep.mubr.f32.mxu0 %v2226_v7  ;;  %s2227_s27 = smov 64   ;;  %s2228_s29 = smov 112   ;;  %vm880_vm3 = vcmask 261248  }
  0x9e   : > { %v1754_v8 = vpack.c.bf16 %v332_v4, %v330_v2  ;;  %v1756_v9 = vpack.c.bf16 %v337_v6, %v335_v5  ;;  %v334_v10 = vld [vmem:[#allocation7 + $0x20] sm:$0xff]  ;;  %v336_v11 = vld [vmem:[#allocation7 + $0x30] sm:$0xff]  ;;  %v339_v12 = vld [vmem:[#allocation7 + $0x48] sm:$0xff]  ;;  %s2229_s19 = smov 48   ;;  %s2230_s20 = smov 32   ;;  %vm1114_vm4 = vcmask 392448  }
  0x9f   : > { %1753 = vmatprep.subr.bf16.mxu0 %v1752_v3  ;;  %v341_v13 = vld [vmem:[#allocation7 + $0x58] sm:$0xff]  ;;  %v1758_v14 = vpack.c.bf16 %v336_v11, %v334_v10  ;;  %v338_v16 = vld [vmem:[#allocation7 + $0x40] sm:$0xff]  ;;  %v340_v17 = vld [vmem:[#allocation7 + $0x50] sm:$0xff]  ;;  %s546_s30 = sld [smem:[#allocation12]]  ;;  %s2231_s9 = smov 96   ;;  %vm1348_vm5 = vcmask 523648  }
  0xa0   : > { %1755 = vmatpush1.bf16.msra.mxu0 %v1754_v8  ;;  %v1760_v15 = vpack.c.bf16 %v341_v13, %v339_v12  ;;  %v343_v18 = vld [vmem:[#allocation7 + $0x68] sm:$0xff]  ;;  %v345_v19 = vld [vmem:[#allocation7 + $0x78] sm:$0xff]  ;;  %v1762_v20 = vpack.c.bf16 %v340_v17, %v338_v16  ;;  %v342_v22 = vld [vmem:[#allocation7 + $0x60] sm:$0xff]  ;;  %s1608_s13 = sld [smem:[#allocation12 + $0x1]]  ;;  %s1615_s26 = sld [smem:[#allocation12 + $0x2]] }
  0xa1   : > { %1757 = vmatprep.subr.bf16.mxu0 %v1756_v9  ;;  %v1764_v21 = vpack.c.bf16 %v345_v19, %v343_v18  ;;  %v344_v23 = vld [vmem:[#allocation7 + $0x70] sm:$0xff]  ;;  %v329_v26 = vld [vmem:[%s2491_s11 + $0x8] sm:$0xff]  ;;  %vm2528_vm2 = vmpackc.low %vm436_vm1, %vm436_vm1  ;;  %s2232_s18 = smov 16   ;;  %s2233_s1 = smov 80  }
  0xa2   : > { %v1766_v24 = vpack.c.bf16 %v344_v23, %v342_v22  ;;  %v328_v25 = vld [vmem:[%s2491_s11] sm:$0xff]  ;;  %v545_v1 = vld [vmem:[#allocation10 + $0x8] sm:$0xff]  ;;  %s1622_s15 = sld [smem:[#allocation12 + $0x3]]  ;;  %s327_s7 = scalar_lea.vmem [#allocation13], %s1590_s12 }
  0xa3   : > { %v544_v63 = vld [vmem:[#allocation10] sm:$0xff]  ;;  %s1465_s10 = sshll.u32 %s327_s7, 4  ;;  %s1452_s12 = scalar_lea.sflag [#allocation5], %s2485_s14  ;;  %s2628_s10 = int_to_ptr.vmem [resolvable:$true] %s1465_s10 }
  0xa4   : > { %1759 = vmatpush1.bf16.msra.mxu0 %v1758_v14 }
  0xa5   : > { %1761 = vmatprep.subr.bf16.mxu0 %v1760_v15  ;;  %v549_v4 = vstv %s546_s30 }
  0xa8   : > { %1763 = vmatpush1.bf16.msra.mxu0 %v1762_v20 }
  0xa9   : > { %1765 = vmatprep.subr.bf16.mxu0 %v1764_v21 }
  0xac   : > { %1767 = vmatpush1.bf16.msra.mxu0 %v1766_v24 }
  0xaf   : > { %1596 = vmatmul.mubr.msk.f32.vlgmr.msra.gmra.mrb[0].mxu0 %vm346_vm0, %v328_v25 }
  0xb0   : > { %423 = vmatprep.mubr.f32.mxu0 %v2226_v7 }
  0xb3   : > { %1597 = vmatmul.mubr.msk.f32.gmra.mrb[2].mxu0 %vm346_vm0, %v329_v26 }
 0x182   : > { %v2513_v27 = vpop.f32.mrb[0].mxu0 }
 0x183   : > { %v421_v28 = vpop.f32.mrb[1].mxu0  ;;  %1681 = vmatprep.mubr.msk.f32.mxu0 %vm436_vm1, %v2513_v27 }
 0x186   : > { %v2517_v29 = vpop.f32.mrb[2].mxu0 }
 0x187   : > { %v427_v30 = vpop.f32.mrb[3].mxu0  ;;  %v2521_v31 = vpack.i.bf16 %v2517_v29, %v2513_v27 }
 0x188   : > { %v1774_v32 = vpack.c.bf16 %v427_v30, %v421_v28  ;;  %v2523_v33 = vpack.i.bf16 %v427_v30, %v421_v28 }
 0x189   : > { %1926 = vrot.lane.b32.xlu0 %v2521_v31, %s2227_s27 }
 0x18a   : > { %1775 = vmatprep.subr.bf16.mxu1 %v1774_v32 }
 0x18b   : > { %1777 = vmatpush3.bf16.msra.mxu1 %v1774_v32 }
 0x1fb   : > { %v1927_v34 = vpop.permute.xlu0 %1926 }
 0x1fc   : > { %v1929_v35 = vunpack.i.h.bf16 %v1927_v34  ;;  %v1928_v36 = vunpack.i.l.bf16 %v1927_v34 }
 0x1fe   : > { %v1768_v38 = vpack.c.bf16 %v1929_v35, %v1928_v36 }
 0x200   : > { %1770 = vmatprep.subr.msk.bf16.mxu0 %vm2528_vm2, %v1768_v38 }
 0x201   : > { %1773 = vmatpush3.bf16.xpose.msk.msra.mxu0 %vm2528_vm2, %v1768_v38 }
 0x208   : > { %1682 = vmatmul.mubr.msk.f32.vlgmr.msra.gmra.mrb[4].mxu0 %vm436_vm1, %v2517_v29 }
 0x2db   : > { %v1683_v39 = vpop.f32.mrb[4].mxu0 }
 0x2dc   : > { %v521_v40 = vmul.f32 0.25, %v1683_v39  ;;  %v511_v41 = vpop.f32.mrb[5].mxu0 }
 0x2dd   : > { %v520_v42 = vmul.f32 0.25, %v511_v41 }
 0x2de   : > { %v525_v43 = vsel %vm436_vm1, %v521_v40, -inf }
 0x2df   : > { %526 = vmax.xlane.f32.xlu1 %v525_v43  ;;  %v522_v44 = vsel %vm436_vm1, %v520_v42, -inf }
 0x2e0   : > { %523 = vmax.xlane.f32.xlu0 %v522_v44 }
 0x2f6   : > { %647 = vrot.lane.b32.xlu0 %v2513_v27, %s2228_s29 }
 0x36c   : > { %v527_v45 = vpop.xlane.xlu1 %526 }
 0x36d   : > { %v529_v46 = vsub.f32 %v521_v40, %v527_v45  ;;  %v524_v47 = vpop.xlane.xlu0 %523 }
 0x36e   : > { %v528_v48 = vsub.f32 %v520_v42, %v524_v47 }
 0x36f   : > { %v532_v49 = vmul.f32 1.442695, %v529_v46 }
 0x370   : > { %v530_v50 = vmul.f32 1.442695, %v528_v48 }
 0x371   : > { %v648_v21 = vpop.permute.xlu0 %647 }
 0x372   : > { %1960 = vpow2.f32 %v530_v50 }
 0x373   : > { %1962 = vpow2.f32 %v532_v49 }
 0x37c   : > { %v1961_v51 = vpop.eup %1960 }
 0x37d   : > { %v534_v52 = vsel %vm436_vm1, %v1961_v51, 0.0  ;;  %v1963_v53 = vpop.eup %1962 }
 0x37e   : > { %535 = vadd.xlane.f32.xlu1 %v534_v52  ;;  %v537_v54 = vsel %vm436_vm1, %v1963_v53, 0.0 }
 0x382   : > { %538 = vadd.xlane.f32.xlu1 %v537_v54 }
 0x393   : > { %1931 = vrot.lane.b32.xlu1 %v2521_v31, %s2229_s19 }
 0x397   : > { %1936 = vrot.lane.b32.xlu1 %v2521_v31, %s2230_s20 }
 0x40b   : > { %v536_v55 = vpop.xlane.xlu1 %535 }
 0x40c   : > { %1964 = vrcp.f32 %v536_v55 }
 0x40f   : > { %v539_v56 = vpop.xlane.xlu1 %538 }
 0x410   : > { %1966 = vrcp.f32 %v539_v56 }
 0x413   : > { %v1932_v57 = vpop.permute.xlu1 %1931 }
 0x414   : > { %v1934_v58 = vunpack.i.h.bf16 %v1932_v57  ;;  %v1933_v59 = vunpack.i.l.bf16 %v1932_v57 }
 0x416   : > { %v1965_v60 = vpop.eup %1964  ;;  %v1778_v61 = vpack.c.bf16 %v1934_v58, %v1933_v59 }
 0x417   : > { %v542_v62 = vmul.f32 %v1965_v60, %v1961_v51  ;;  %v1937_v12 = vpop.permute.xlu1 %1936 }
 0x418   : > { %1780 = vmatprep.subr.msk.bf16.mxu1 %vm2528_vm2, %v1778_v61  ;;  %v1939_v17 = vunpack.i.h.bf16 %v1937_v12  ;;  %v1938_v18 = vunpack.i.l.bf16 %v1937_v12 }
 0x419   : > { %v547_v3 = vsub.f32 %v544_v63, %v542_v62 }
 0x41a   : > { %v1967_v0 = vpop.eup %1966  ;;  %v1788_v22 = vpack.c.bf16 %v1939_v17, %v1938_v18 }
 0x41b   : > { %v543_v2 = vmul.f32 %v1967_v0, %v1963_v53  ;;  %v550_v7 = vmul.f32 %v549_v4, %v547_v3 }
 0x41d   : > { %v548_v5 = vsub.f32 %v545_v1, %v543_v2  ;;  %v552_v10 = vadd.f32 %v550_v7, %v542_v62 }
 0x41f   : > { %v551_v6 = vmul.f32 %v549_v4, %v548_v5  ;;  %v554_v11 = vsel %vm436_vm1, %v552_v10, 0.0 }
 0x421   : > { %v553_v8 = vadd.f32 %v551_v6, %v543_v2  ;;  %v764_v6 = vld [vmem:[#allocation10 + $0x18] sm:$0xff] }
 0x423   : > { %v557_v9 = vsel %vm436_vm1, %v553_v8, 0.0 }
 0x424   : > { %558 = vadd.xlane.f32.xlu1 %v557_v9  ;;  %v763_v9 = vld [vmem:[#allocation10 + $0x10] sm:$0xff] }
 0x428   : > { %555 = vadd.xlane.f32.xlu1 %v554_v11 }
 0x439   : > { %649 = vrot.lane.b32.xlu1 %v2517_v29, %s2228_s29 }
 0x43d   : > { %883 = vrot.lane.b32.xlu1 %v2513_v27, %s2231_s9 }
 0x441   : > { %885 = vrot.lane.b32.xlu1 %v2517_v29, %s2231_s9 }
 0x4b1   : > { %v559_v13 = vpop.xlane.xlu1 %558 }
 0x4b2   : > { %1968 = vrcp.f32 %v559_v13 }
 0x4b5   : > { %v556_v14 = vpop.xlane.xlu1 %555 }
 0x4b6   : > { %1970 = vrcp.f32 %v556_v14 }
 0x4b9   : > { %v650_v23 = vpop.permute.xlu1 %649 }
 0x4bc   : > { %v1969_v15 = vpop.eup %1968 }
 0x4bd   : > { %v563_v20 = vmul.f32 %v1969_v15, %v553_v8  ;;  %v884_v24 = vpop.permute.xlu1 %883 }
 0x4c0   : > { %v1971_v16 = vpop.eup %1970 }
 0x4c1   : > { %v562_v19 = vmul.f32 %v1971_v16, %v552_v10  ;;  %v886_v25 = vpop.permute.xlu1 %885  ;;  %v768_v10 = vstv %s1608_s13 }
 0x4c3   : > { %1688 = vmatprep.mubr.msk.f32.mxu1 %vm436_vm1, %v562_v19  ;;  %v1000_v19 = vld [vmem:[#allocation10 + $0x28] sm:$0xff] }
 0x4c4   : > { %1689 = vmatmul.mubr.msk.f32.vlgmr.msra.gmra.mrb[0].mxu1 %vm436_vm1, %v563_v20 }
 0x4c5   : > { %1783 = vmatpush3.bf16.xpose.msk.msra.mxu1 %vm2528_vm2, %v1778_v61  ;;  %1695 = vmatprep.mubr.msk.f32.mxu1 %vm436_vm1, %v648_v21 }
 0x4c6   : > { %1790 = vmatprep.subr.msk.bf16.mxu1 %vm2528_vm2, %v1788_v22 }
 0x4cc   : > { %1696 = vmatmul.mubr.msk.f32.vlgmr.msra.gmra.mrb[2].mxu1 %vm436_vm1, %v650_v23  ;;  %v999_v23 = vld [vmem:[#allocation10 + $0x20] sm:$0xff] }
 0x4cd   : > { %1793 = vmatpush3.bf16.xpose.msk.msra.mxu1 %vm2528_vm2, %v1788_v22  ;;  %1709 = vmatprep.mubr.msk.f32.mxu1 %vm436_vm1, %v884_v24 }
 0x4d4   : > { %1710 = vmatmul.mubr.msk.f32.vlgmr.msra.gmra.mrb[4].mxu1 %vm436_vm1, %v886_v25  ;;  %v1004_v25 = vstv %s1615_s26 }
 0x597   : > { %v1690_v26 = vpop.f32.mrb[0].mxu1 }
 0x598   : > { %646 = vst.msk [vmem:[#allocation2 + $0x8] sm:$0xff] %vm436_vm1, %v1690_v26  ;;  %v636_v28 = vpop.f32.mrb[1].mxu1 }
 0x599   : > { %645 = vst.msk [vmem:[#allocation2] sm:$0xff] %vm436_vm1, %v636_v28 }
 0x59f   : > { %v1697_v30 = vpop.f32.mrb[2].mxu1 }
 0x5a0   : > { %v739_v32 = vmul.f32 0.25, %v1697_v30  ;;  %v729_v34 = vpop.f32.mrb[3].mxu1 }
 0x5a1   : > { %v738_v35 = vmul.f32 0.25, %v729_v34 }
 0x5a2   : > { %v743_v36 = vsel %vm436_vm1, %v739_v32, -inf }
 0x5a3   : > { %744 = vmax.xlane.f32.xlu0 %v743_v36  ;;  %v740_v38 = vsel %vm436_vm1, %v738_v35, -inf }
 0x5a4   : > { %741 = vmax.xlane.f32.xlu1 %v740_v38 }
 0x5a7   : > { %v1711_v39 = vpop.f32.mrb[4].mxu1 }
 0x5a8   : > { %v975_v40 = vmul.f32 0.25, %v1711_v39  ;;  %v965_v41 = vpop.f32.mrb[5].mxu1 }
 0x5a9   : > { %v974_v42 = vmul.f32 0.25, %v965_v41 }
 0x5aa   : > { %v979_v43 = vsel %vm436_vm1, %v975_v40, -inf }
 0x5ab   : > { %980 = vmax.xlane.f32.xlu1 %v979_v43  ;;  %v976_v44 = vsel %vm436_vm1, %v974_v42, -inf }
 0x5ac   : > { %977 = vmax.xlane.f32.xlu0 %v976_v44 }
 0x630   : > { %v745_v45 = vpop.xlane.xlu0 %744 }
 0x631   : > { %v747_v46 = vsub.f32 %v739_v32, %v745_v45  ;;  %v742_v47 = vpop.xlane.xlu1 %741 }
 0x632   : > { %v746_v48 = vsub.f32 %v738_v35, %v742_v47 }
 0x633   : > { %v750_v49 = vmul.f32 1.442695, %v747_v46 }
 0x634   : > { %v748_v50 = vmul.f32 1.442695, %v746_v48 }
 0x635   : > { %1972 = vpow2.f32 %v750_v49 }
 0x636   : > { %1974 = vpow2.f32 %v748_v50 }
 0x638   : > { %v981_v51 = vpop.xlane.xlu1 %980 }
 0x639   : > { %v983_v52 = vsub.f32 %v975_v40, %v981_v51  ;;  %v978_v53 = vpop.xlane.xlu0 %977 }
 0x63a   : > { %v982_v54 = vsub.f32 %v974_v42, %v978_v53 }
 0x63b   : > { %v986_v55 = vmul.f32 1.442695, %v983_v52 }
 0x63c   : > { %v984_v56 = vmul.f32 1.442695, %v982_v54 }
 0x63d   : > { %1976 = vpow2.f32 %v986_v55 }
 0x63e   : > { %1978 = vpow2.f32 %v984_v56 }
 0x63f   : > { %v1973_v57 = vpop.eup %1972 }
 0x640   : > { %v1975_v58 = vpop.eup %1974  ;;  %v755_v59 = vsel %vm436_vm1, %v1973_v57, 0.0 }
 0x641   : > { %756 = vadd.xlane.f32.xlu1 %v755_v59  ;;  %v752_v60 = vsel %vm436_vm1, %v1975_v58, 0.0 }
 0x642   : > { %753 = vadd.xlane.f32.xlu0 %v752_v60 }
 0x647   : > { %v1977_v61 = vpop.eup %1976 }
 0x648   : > { %v1979_v62 = vpop.eup %1978  ;;  %v991_v63 = vsel %vm436_vm1, %v1977_v61, 0.0 }
 0x649   : > { %992 = vadd.xlane.f32.xlu1 %v991_v63  ;;  %v988_v0 = vsel %vm436_vm1, %v1979_v62, 0.0 }
 0x64a   : > { %989 = vadd.xlane.f32.xlu0 %v988_v0 }
 0x6ce   : > { %v757_v1 = vpop.xlane.xlu1 %756 }
 0x6cf   : > { %1980 = vrcp.f32 %v757_v1  ;;  %v754_v2 = vpop.xlane.xlu0 %753 }
 0x6d0   : > { %1982 = vrcp.f32 %v754_v2 }
 0x6d6   : > { %v993_v3 = vpop.xlane.xlu1 %992 }
 0x6d7   : > { %1984 = vrcp.f32 %v993_v3  ;;  %v990_v4 = vpop.xlane.xlu0 %989 }
 0x6d8   : > { %1986 = vrcp.f32 %v990_v4 }
 0x6d9   : > { %v1981_v5 = vpop.eup %1980 }
 0x6da   : > { %v1983_v7 = vpop.eup %1982  ;;  %v761_v8 = vmul.f32 %v1981_v5, %v1973_v57 }
 0x6db   : > { %v760_v11 = vmul.f32 %v1983_v7, %v1975_v58 }
 0x6dc   : > { %v767_v12 = vsub.f32 %v764_v6, %v761_v8 }
 0x6dd   : > { %v766_v13 = vsub.f32 %v763_v9, %v760_v11 }
 0x6de   : > { %v770_v14 = vmul.f32 %v768_v10, %v767_v12 }
 0x6df   : > { %v769_v15 = vmul.f32 %v768_v10, %v766_v13 }
 0x6e0   : > { %v772_v16 = vadd.f32 %v770_v14, %v761_v8 }
 0x6e1   : > { %v1985_v17 = vpop.eup %1984  ;;  %v771_v18 = vadd.f32 %v769_v15, %v760_v11 }
 0x6e2   : > { %v1987_v20 = vpop.eup %1986  ;;  %v776_v21 = vsel %vm436_vm1, %v772_v16, 0.0  ;;  %v997_v22 = vmul.f32 %v1985_v17, %v1977_v61 }
 0x6e3   : > { %777 = vadd.xlane.f32.xlu1 %v776_v21  ;;  %v773_v24 = vsel %vm436_vm1, %v771_v18, 0.0  ;;  %v996_v26 = vmul.f32 %v1987_v20, %v1979_v62  ;;  %v1233_v21 = vld [vmem:[#allocation10 + $0x30] sm:$0xff] }
 0x6e4   : > { %774 = vadd.xlane.f32.xlu0 %v773_v24  ;;  %v1003_v28 = vsub.f32 %v1000_v19, %v997_v22 }
 0x6e5   : > { %v1002_v30 = vsub.f32 %v999_v23, %v996_v26  ;;  %v1238_v23 = vstv %s1622_s15 }
 0x6e6   : > { %v1006_v32 = vmul.f32 %v1004_v25, %v1003_v28 }
 0x6e7   : > { %v1005_v34 = vmul.f32 %v1004_v25, %v1002_v30 }
 0x6e8   : > { %v1008_v35 = vadd.f32 %v1006_v32, %v997_v22 }
 0x6e9   : > { %v1007_v36 = vadd.f32 %v1005_v34, %v996_v26  ;;  %v1234_v26 = vld [vmem:[#allocation10 + $0x38] sm:$0xff] }
 0x6ea   : > { %v1012_v38 = vsel %vm436_vm1, %v1008_v35, 0.0 }
 0x6eb   : > { %1013 = vadd.xlane.f32.xlu1 %v1012_v38  ;;  %v1009_v39 = vsel %vm436_vm1, %v1007_v36, 0.0 }
 0x6ec   : > { %1010 = vadd.xlane.f32.xlu0 %v1009_v39 }
 0x6fc   : > { %1946 = vrot.lane.b32.xlu1 %v2523_v33, %s2231_s9  ;;  %s2234_s9 = smov [#allocation13]  }
 0x6fd   : > { %s2141_s13 = sshll.u32 %s2234_s9, 4  ;;  %s2142_s13 = int_to_ptr.vmem [resolvable:$false] %s2141_s13 }
 0x6fe   : > { %s2143_s26 = scalar_lea.vmem %s2142_s13, 512  ;;  %p2144_p7 = scmp.lt.s32.totalorder %s2628_s10, %s2142_s13 }
 0x700   : > { %1951 = vrot.lane.b32.xlu1 %v2521_v31, %s2232_s18 }
 0x702   : > { %1941 = vrot.lane.b32.xlu0 %v2523_v33, %s2228_s29  ;;  %s1634_s29 = sshll.u32 %s2293_s25, 8  ;;  %s2137_s25 = scalar_lea.vmem %s2628_s10, 256 }
 0x703   : > { %s2633_s30 = scalar_lea.hbm %s2685_s6, %s1634_s29  ;;  %p2138_p10 = scmp.ne.s32.totalorder %s2628_s10, %s2137_s25 }
 0x704   : > { %1119 = vrot.lane.b32.xlu1 %v2517_v29, %s2233_s1  ;;  %p2145_p13 = scmp.lt.s32.totalorder %s2143_s26, %s2137_s25 }
 0x705   : > { %p2139_p4 = pnand %p2138_p10, %p2433_p1 }
 0x706   : > { %1117 = vrot.lane.b32.xlu0 %v2513_v27, %s2233_s1  ;;  %p2146_p3 = por %p2145_p13, %p2144_p7 }
 0x707   : > { %p2140_p5 = pneg %p2139_p4 }
 0x709   : > { %p2147_p8 = pnand %p2146_p3, %p2140_p5 }
 0x770   : > { %v778_v41 = vpop.xlane.xlu1 %777 }
 0x771   : > { %v775_v40 = vpop.xlane.xlu0 %774 }
 0x772   : > { %1988 = vrcp.f32 %v775_v40 }
 0x773   : > { %1990 = vrcp.f32 %v778_v41 }
 0x778   : > { %v1014_v42 = vpop.xlane.xlu1 %1013 }
 0x779   : > { %v1011_v43 = vpop.xlane.xlu0 %1010 }
 0x77a   : > { %1992 = vrcp.f32 %v1011_v43 }
 0x77b   : > { %1994 = vrcp.f32 %v1014_v42 }
 0x77c   : > { %v1989_v44 = vpop.eup %1988  ;;  %v1947_v31 = vpop.permute.xlu1 %1946 }
 0x77d   : > { %v1942_v45 = vpop.permute.xlu0 %1941  ;;  %v781_v46 = vmul.f32 %v1989_v44, %v771_v18  ;;  %v1949_v47 = vunpack.i.h.bf16 %v1947_v31  ;;  %v1948_v48 = vunpack.i.l.bf16 %v1947_v31  ;;  %v1991_v51 = vpop.eup %1990 }
 0x77e   : > { %v1944_v49 = vunpack.i.h.bf16 %v1942_v45  ;;  %v1943_v50 = vunpack.i.l.bf16 %v1942_v45  ;;  %v782_v56 = vmul.f32 %v1991_v51, %v772_v16  ;;  %v1354_v51 = vld [vmem:[#allocation9 + $0x8] sm:$0xff] }
 0x77f   : > { %1702 = vmatprep.mubr.msk.f32.mxu0 %vm436_vm1, %v781_v46  ;;  %v1794_v52 = vpack.c.bf16 %v1949_v47, %v1948_v48 }
 0x780   : > { %v1784_v29 = vpack.c.bf16 %v1944_v49, %v1943_v50  ;;  %v1952_v27 = vpop.permute.xlu1 %1951 }
 0x781   : > { %v1954_v53 = vunpack.i.h.bf16 %v1952_v27  ;;  %v1953_v54 = vunpack.i.l.bf16 %v1952_v27  ;;  %v1118_v61 = vpop.permute.xlu0 %1117  ;;  %v1353_v27 = vld [vmem:[#allocation9] sm:$0xff] }
 0x782   : > { %1785 = vmatprep.subr.bf16.mxu0 %v1784_v29 }
 0x783   : > { %1787 = vmatpush3.bf16.msra.mxu0 %v1784_v29  ;;  %v1798_v59 = vpack.c.bf16 %v1954_v53, %v1953_v54  ;;  %v1808_v53 = vpack.c.bf16 %v1354_v51, %v1353_v27  ;;  %v1356_v54 = vld [vmem:[#allocation9 + $0x18] sm:$0xff] }
 0x784   : > { %v1993_v55 = vpop.eup %1992  ;;  %1795 = vmatprep.subr.bf16.mxu0 %v1794_v52  ;;  %v1120_v62 = vpop.permute.xlu1 %1119 }
 0x785   : > { %v1995_v57 = vpop.eup %1994  ;;  %v1017_v58 = vmul.f32 %v1993_v55, %v1007_v36 }
 0x786   : > { %1703 = vmatmul.mubr.msk.f32.vlgmr.msra.gmra.mrb[6].mxu0 %vm436_vm1, %v782_v56  ;;  %v1018_v60 = vmul.f32 %v1995_v57, %v1008_v35  ;;  %v1357_v56 = vld [vmem:[#allocation9 + $0x20] sm:$0xff]  ;;  %v1358_v57 = vld [vmem:[#allocation9 + $0x28] sm:$0xff] }
 0x787   : > { %1797 = vmatpush3.bf16.msra.mxu0 %v1794_v52  ;;  %1716 = vmatprep.mubr.msk.f32.mxu0 %vm436_vm1, %v1017_v58  ;;  %v1355_v52 = vld [vmem:[#allocation9 + $0x10] sm:$0xff]  ;;  %v1816_v58 = vpack.c.bf16 %v1358_v57, %v1357_v56 }
 0x788   : > { %1800 = vmatprep.subr.msk.bf16.mxu0 %vm2528_vm2, %v1798_v59  ;;  %v1812_v55 = vpack.c.bf16 %v1356_v54, %v1355_v52 }
 0x78a   : > { %1717 = vmatmul.mubr.msk.f32.vlgmr.msra.gmra.mrb[8].mxu0 %vm436_vm1, %v1018_v60  ;;  %v1360_v60 = vld [vmem:[#allocation9 + $0x38] sm:$0xff] }
 0x78b   : > { %1723 = vmatprep.mubr.msk.f32.mxu0 %vm436_vm1, %v1118_v61 }
 0x790   : > { %1803 = vmatpush3.bf16.xpose.msk.msra.mxu0 %vm2528_vm2, %v1798_v59  ;;  %v1359_v59 = vld [vmem:[#allocation9 + $0x30] sm:$0xff] }
 0x791   : > { %v1820_v61 = vpack.c.bf16 %v1360_v60, %v1359_v59 }
 0x797   : > { %1724 = vmatmul.mubr.msk.f32.vlgmr.msra.gmra.mrb[10].mxu0 %vm436_vm1, %v1120_v62 }
 0x859   : > { %v1704_v63 = vpop.f32.mrb[6].mxu0 }
 0x85a   : > { %v863_v0 = vpop.f32.mrb[7].mxu0 }
 0x85d   : > { %v1718_v1 = vpop.f32.mrb[8].mxu0 }
 0x85e   : > { %v1097_v2 = vpop.f32.mrb[9].mxu0 }
 0x86a   : > { %v1725_v3 = vpop.f32.mrb[10].mxu0 }
 0x86b   : > { %v1209_v4 = vmul.f32 0.25, %v1725_v3  ;;  %v1199_v5 = vpop.f32.mrb[11].mxu0 }
 0x86c   : > { %v1208_v6 = vmul.f32 0.25, %v1199_v5 }
 0x86d   : > { %v1213_v7 = vsel %vm436_vm1, %v1209_v4, -inf }
 0x86e   : > { %1214 = vmax.xlane.f32.xlu1 %v1213_v7  ;;  %v1210_v8 = vsel %vm436_vm1, %v1208_v6, -inf }
 0x86f   : > { %1211 = vmax.xlane.f32.xlu0 %v1210_v8 }
 0x8fb   : > { %v1215_v9 = vpop.xlane.xlu1 %1214 }
 0x8fc   : > { %v1217_v37 = vsub.f32 %v1209_v4, %v1215_v9  ;;  %v1212_v10 = vpop.xlane.xlu0 %1211  ;;  %v1625_v4 = vld [vmem:[%s2682_s3] ss:$0 sm:$0xff] }
 0x8fd   : > { %v1216_v11 = vsub.f32 %v1208_v6, %v1212_v10 }
 0x8fe   : > { %v1220_v12 = vmul.f32 1.442695, %v1217_v37 }
 0x8ff   : > { %v1218_v13 = vmul.f32 1.442695, %v1216_v11 }
 0x901   : > { %1996 = vpow2.f32 %v1218_v13 }
 0x902   : > { %1998 = vpow2.f32 %v1220_v12 }
 0x90b   : > { %v1997_v14 = vpop.eup %1996 }
 0x90c   : > { %v1222_v15 = vsel %vm436_vm1, %v1997_v14, 0.0  ;;  %v1999_v16 = vpop.eup %1998 }
 0x90d   : > { %1223 = vadd.xlane.f32.xlu0 %v1222_v15  ;;  %v1225_v17 = vsel %vm436_vm1, %v1999_v16, 0.0 }
 0x911   : > { %1226 = vadd.xlane.f32.xlu0 %v1225_v17 }
 0x99a   : > { %v1224_v18 = vpop.xlane.xlu0 %1223 }
 0x99b   : > { %2000 = vrcp.f32 %v1224_v18 }
 0x99e   : > { %v1227_v19 = vpop.xlane.xlu0 %1226 }
 0x99f   : > { %2002 = vrcp.f32 %v1227_v19 }
 0x9a5   : > { %v2001_v20 = vpop.eup %2000 }
 0x9a6   : > { %v1230_v22 = vmul.f32 %v2001_v20, %v1997_v14 }
 0x9a8   : > { %v1236_v24 = vsub.f32 %v1233_v21, %v1230_v22 }
 0x9a9   : > { %v2003_v25 = vpop.eup %2002 }
 0x9aa   : > { %v1239_v28 = vmul.f32 %v1238_v23, %v1236_v24  ;;  %v1231_v30 = vmul.f32 %v2003_v25, %v1999_v16 }
 0x9ac   : > { %v1241_v32 = vadd.f32 %v1239_v28, %v1230_v22  ;;  %v1237_v34 = vsub.f32 %v1234_v26, %v1231_v30 }
 0x9ae   : > { %v1243_v35 = vsel %vm436_vm1, %v1241_v32, 0.0  ;;  %v1240_v36 = vmul.f32 %v1238_v23, %v1237_v34 }
 0x9af   : > { %1244 = vadd.xlane.f32.xlu1 %v1243_v35 }
 0x9b0   : > { %v1242_v38 = vadd.f32 %v1240_v36, %v1231_v30 }
 0x9b2   : > { %v1246_v39 = vsel %vm436_vm1, %v1242_v38, 0.0 }
 0x9b3   : > { %1247 = vadd.xlane.f32.xlu0 %v1246_v39 }
 0x9c0   : > { %1956 = vrot.lane.b32.xlu1 %v2523_v33, %s2233_s1 }
 0x9c4   : > { %876 = vrot.lane.b32.xlu1 %v1704_v63, %s2232_s18 }
 0x9c8   : > { %1108 = vrot.lane.b32.xlu1 %v1097_v2, %s2230_s20 }
 0x9c9   : > { %874 = vrot.lane.b32.xlu0 %v863_v0, %s2232_s18 }
 0x9cd   : > { %1110 = vrot.lane.b32.xlu0 %v1718_v1, %s2230_s20 }
 0xa3c   : > { %v1245_v40 = vpop.xlane.xlu1 %1244 }
 0xa3d   : > { %2004 = vrcp.f32 %v1245_v40 }
 0xa40   : > { %v1957_v41 = vpop.permute.xlu1 %1956  ;;  %v1248_v42 = vpop.xlane.xlu0 %1247 }
 0xa41   : > { %v1959_v43 = vunpack.i.h.bf16 %v1957_v41  ;;  %v1958_v44 = vunpack.i.l.bf16 %v1957_v41  ;;  %2006 = vrcp.f32 %v1248_v42 }
 0xa43   : > { %v1804_v31 = vpack.c.bf16 %v1959_v43, %v1958_v44 }
 0xa44   : > { %v877_v45 = vpop.permute.xlu1 %876  ;;  %v875_v46 = vpop.permute.xlu0 %874 }
 0xa45   : > { %882 = vst.msk [vmem:[#allocation2 + $0x8] sm:$0xff] %vm880_vm3, %v877_v45  ;;  %881 = vst.msk [vmem:[#allocation2] sm:$0xff] %vm880_vm3, %v875_v46  ;;  %1805 = vmatprep.subr.bf16.mxu1 %v1804_v31 }
 0xa46   : > { %1807 = vmatpush3.bf16.msra.mxu1 %v1804_v31 }
 0xa47   : > { %v2005_v33 = vpop.eup %2004  ;;  %1809 = vmatprep.subr.bf16.mxu1 %v1808_v53 }
 0xa48   : > { %v1109_v47 = vpop.permute.xlu1 %1108  ;;  %v1111_v48 = vpop.permute.xlu0 %1110  ;;  %v1251_v49 = vmul.f32 %v2005_v33, %v1241_v32 }
 0xa49   : > { %1115 = vst.msk [vmem:[#allocation2] sm:$0xff] %vm1114_vm4, %v1109_v47  ;;  %1116 = vst.msk [vmem:[#allocation2 + $0x8] sm:$0xff] %vm1114_vm4, %v1111_v48 }
 0xa4a   : > { %1730 = vmatprep.mubr.msk.f32.mxu1 %vm436_vm1, %v1251_v49 }
 0xa4b   : > { %v2007_v50 = vpop.eup %2006 }
 0xa4c   : > { %v1252_v29 = vmul.f32 %v2007_v50, %v1242_v38 }
 0xa4e   : > { %1731 = vmatmul.mubr.msk.f32.vlgmr.msra.gmra.mrb[6].mxu1 %vm436_vm1, %v1252_v29 }
 0xa4f   : > { %1811 = vmatpush3.bf16.msra.mxu1 %v1808_v53 }
 0xa50   : > { %1813 = vmatprep.subr.bf16.mxu1 %v1812_v55 }
 0xa53   : > { %1815 = vmatpush3.bf16.msra.mxu1 %v1812_v55 }
 0xa54   : > { %1817 = vmatprep.subr.bf16.mxu1 %v1816_v58 }
 0xa57   : > { %1819 = vmatpush3.bf16.msra.mxu1 %v1816_v58 }
 0xa58   : > { %1821 = vmatprep.subr.bf16.mxu1 %v1820_v61 }
 0xa5b   : > { %1823 = vmatpush3.bf16.msra.mxu1 %v1820_v61 }
 0xb21   : > { %v1732_v62 = vpop.f32.mrb[6].mxu1 }
 0xb22   : > { %1344 = vrot.lane.b32.xlu0 %v1732_v62, %s2229_s19  ;;  %v1331_v63 = vpop.f32.mrb[7].mxu1 }
 0xb23   : > { %1342 = vrot.lane.b32.xlu1 %v1331_v63, %s2229_s19 }
 0xb94   : > { %v1345_v0 = vpop.permute.xlu0 %1344 }
 0xb95   : > { %1350 = vst.msk [vmem:[#allocation2 + $0x8] sm:$0xff] %vm1348_vm5, %v1345_v0  ;;  %v1343_v1 = vpop.permute.xlu1 %1342 }
 0xb96   : > { %1349 = vst.msk [vmem:[#allocation2] sm:$0xff] %vm1348_vm5, %v1343_v1 }
 0xb9c   : > { %v1352_v3 = vld [vmem:[#allocation2 + $0x8] sm:$0xff] }
 0xb9d   : > { %v1351_v2 = vld [vmem:[#allocation2] sm:$0xff] }
 0xb9e   : > { %1749 = vmatprep.mubr.msk.f32.mxu1 %vm346_vm0, %v1351_v2 }
 0xb9f   : > { %1750 = vmatmul.mubr.msk.f32.vlgmr.msra.gmra.mrb[8].mxu1 %vm346_vm0, %v1352_v3 }
 0xc72   : > { %v1751_v5 = vpop.f32.mrb[8].mxu1 }
 0xc73   : > { %v1446_v6 = vadd.f32 %v1751_v5, %v1625_v4  ;;  %v1440_v7 = vpop.f32.mrb[9].mxu1 }
 0xc74   : > { %v1441_v8 = vadd.f32 %v1625_v4, %v1440_v7 }
 0xc75   : > { %1450 = vst.msk [vmem:[%s327_s7 + $0x8] sm:$0xff] %vm346_vm0, %v1446_v6 }
 0xc76   : > { %1449 = vst.msk [vmem:[%s327_s7] sm:$0xff] %vm346_vm0, %v1441_v8 }
 0xc77   : > { %2150 = shalt.err (!%p2147_p8)
}
 0xc78   : > { %s2151_s18 = scalar_lea.hbm %s2633_s30, 256  ;;  %s2155_s7 = scalar_lea.hbm %s2685_s6, 512 }
 0xc79   : > { %p2152_p11 = scmp.ne.s32.totalorder %s2633_s30, %s2151_s18  ;;  %p2156_p0 = scmp.lt.u32.totalorder %s2633_s30, %s2685_s6 }
 0xc7a   : > { %p2157_p2 = scmp.lt.u32.totalorder %s2155_s7, %s2151_s18  ;;  %p2159_p10 = scmp.lt.u32.totalorder %s2151_s18, %s2633_s30 }
 0xc7b   : > { %p2153_p9 = pnand %p2152_p11, %p2433_p1 }
 0xc7c   : > { %p2158_p6 = por %p2157_p2, %p2156_p0 }
 0xc7d   : > { %p2154_p12 = pneg %p2153_p9 }
 0xc7e   : > { %p2160_p4 = por %p2159_p10, %p2158_p6 }
 0xc80   : > { %p2161_p5 = pnand %p2160_p4, %p2154_p12 }
 0xc82   : > { %2164 = shalt.err (!%p2161_p5)
}
 0xc83   : > { %s2235_s29 = smov 128   ;;  %s2236_s19 = smov 8  }
 0xc84   : > { %1842 = dma.vmem_to_hbm [thread:$0]  (%p2433_p1), %s2628_s10, 256, %s2633_s30, %s1452_s12, %s2235_s29, %s2235_s29, %s2236_s19  }
 0xc85 PF: > { %s1480_s20 = sand.u32 1, %s2203_s21   ;;  %p2709_p7 = scmp.ne.s32.totalorder %s2691_s28, 0 }
 0xc86   : > { %p2710_p13 = scmp.ge.s32.totalorder %s2215_s24, 2  ;;  %s1481_s25 = scalar_lea.sflag [#allocation5], %s1480_s20 }
 0xc88   : > { %p1862_p3 = pnand %p2710_p13, %p2709_p7 }
 0xc8a   : > { %2198 = dma.done.wait (!%p1862_p3), %s1481_s25, 256  }
 0xc8b   : > { %2200 = vsyncadd (!%p1862_p3), %s1481_s25, 4294967040  ;;  %p22_p8 = scmp.ge.s32.totalorder %s2420_s16, 4   ;;  %s2711_s21 = smov %s2207_s22 }
 0xc8c   : > { %s2712_s22 = smov %s2211_s23  ;;  %s2713_s23 = smov %s2429_s8 }
 0xc8d   : > { %s2714_s24 = smov %s2420_s16  ;;  %24 = sbr.rel (!%p22_p8) target bundleno = 10 (0xa), region = 109 }
 0xc94   :  { %1486 = vsyncpa [#allocation4], 1 }
 0xc95   :  { %1488 = vsyncpa [#allocation4 + $0x1], 1 }
 0xc96   :  { %1489 = vsyncpa [#allocation8], 1 }
 0xc97   :  { %1490 = vsyncpa [#allocation11], 1 }
 0xc98   :  { %1491 = vsyncpa [#allocation5], 1 }
 0xc99   :  { %1493 = vsyncpa [#allocation5 + $0x1], 1 }
 0xc9a   :  { %1494 = vsyncpa [#allocation6], 1 }
 0xc9b   :  { %1496 = vsyncpa [#allocation6 + $0x1], 1 }

</bundles_post_ra>
